<compile_context>
chip_gen: v5e
topology: v5e:2x2
jax: 0.10.0
libtpu: 0.0.40
codegen_flags: <defaults>
</compile_context>

<pallas_src>
import jax
import jax.numpy as jnp
from jax.experimental import pallas as pl
from jax.experimental.pallas import tpu as pltpu

LN_EPS = 1e-5  # torch nn.LayerNorm default


def datemlp_kernel(x_ref, w_ref, b_ref, gamma_ref, beta_ref, o_ref):
    # ---- Linear: h = x @ W + b (MXU, f32 accumulator) ----
    h = jnp.dot(x_ref[...], w_ref[...], preferred_element_type=jnp.float32)
    h = h + b_ref[...]

    # ---- ReLU ----
    h = jnp.maximum(h, 0.0)

    # ---- LayerNorm over the feature (last) axis ----
    # Single-pass variance: E[h^2] - mean^2 so the two row-reductions are
    # independent and overlap on the XLU units; clamp at 0 before rsqrt.
    mean = jnp.mean(h, axis=-1, keepdims=True)
    mean_sq = jnp.mean(h * h, axis=-1, keepdims=True)
    var = jnp.maximum(mean_sq - mean * mean, 0.0)
    inv = jax.lax.rsqrt(var + LN_EPS)                 # EUP
    scale = inv * gamma_ref[...]
    shift = beta_ref[...] - mean * scale

    # ---- Dropout (eval mode) = identity ----
    o_ref[...] = (h * scale + shift).astype(o_ref.dtype)


def _round_up(x, m):
    return ((x + m - 1) // m) * m


def _sublane_multiple(dtype):
    # (8,128) tiling is the f32 case; bf16 packs 16 sublanes, int8/fp8 pack 32.
    return max(8, 32 // jnp.dtype(dtype).itemsize)


def _vmem_bytes(bm, d_in, d_out, x_dtype, w_dtype, out_dtype):
    """Estimated VMEM footprint for a batch tile of bm rows."""
    in_it = jnp.dtype(x_dtype).itemsize
    w_it = jnp.dtype(w_dtype).itemsize
    out_it = jnp.dtype(out_dtype).itemsize
    lane_in = _round_up(d_in, 128)    # (bm, 8) x block is lane-padded to 128
    lane_out = _round_up(d_out, 128)
    x_tile = 2 * bm * lane_in * in_it                  # double-buffered input tile
    o_tile = 2 * bm * lane_out * out_it                # double-buffered output tile
    params = 2 * (_round_up(d_in, 8) * lane_out + 3 * 8 * lane_out) * w_it
    temps = 4 * bm * lane_out * 4                      # f32 h / h*h / scaled temporaries
    return x_tile + o_tile + params + temps


def date_mlp(x, w, b, gamma, beta, *, block_m=4096, out_dtype=None,
             vmem_limit_bytes=None, core_parallel=False):
    """x: (B, D_in), w: (D_in, D_out), b/gamma/beta: (1, D_out) -> (B, D_out)."""
    B, D_in = x.shape
    D_out = w.shape[1]
    out_dtype = jnp.dtype(x.dtype) if out_dtype is None else jnp.dtype(out_dtype)

    # VMEM capacity (fall back to the v7x 64 MiB floor if the query fails).
    try:
        vmem_cap = int(pltpu.get_tpu_info().vmem_capacity_bytes)
    except Exception:
        vmem_cap = 64 << 20
    budget_cap = min((vmem_cap * 3) // 4, 96 << 20)    # headroom under physical VMEM
    headroom = 4 << 20

    # Batch tile: as big as requested / the whole batch, shrunk to fit VMEM,
    # with dtype-aware sublane rounding when it does not cover the full batch.
    sub = max(_sublane_multiple(x.dtype), _sublane_multiple(out_dtype))
    fixed = _vmem_bytes(0, D_in, D_out, x.dtype, w.dtype, out_dtype)
    per_row = max(_vmem_bytes(1, D_in, D_out, x.dtype, w.dtype, out_dtype) - fixed, 1)
    max_rows = max(sub, (budget_cap - headroom - fixed) // per_row)

    bm = min(block_m, B, int(max_rows))
    if bm < B:
        bm = max(sub, (bm // sub) * sub)
    grid = (pl.cdiv(B, bm),)
    # If B % bm != 0 the last tile is padded. That is safe: LayerNorm stats are
    # per-row (feature-axis only), so padded rows never contaminate valid rows,
    # and Pallas masks the write-back of the out-of-range rows.

    if vmem_limit_bytes is None:
        vmem_limit_bytes = _vmem_bytes(bm, D_in, D_out, x.dtype, w.dtype, out_dtype) + headroom
        vmem_limit_bytes = min(max(vmem_limit_bytes, 16 << 20), budget_cap)

    sem = pltpu.CORE_PARALLEL if core_parallel else pltpu.PARALLEL

    return pl.pallas_call(
        datemlp_kernel,
        out_shape=jax.ShapeDtypeStruct((B, D_out), out_dtype),
        grid=grid,
        in_specs=[
            pl.BlockSpec((bm, D_in), lambda i: (i, 0)),       # x: streamed per step
            pl.BlockSpec((D_in, D_out), lambda i: (0, 0)),    # W: VMEM-resident
            pl.BlockSpec((1, D_out), lambda i: (0, 0)),       # b: VMEM-resident
            pl.BlockSpec((1, D_out), lambda i: (0, 0)),       # gamma: VMEM-resident
            pl.BlockSpec((1, D_out), lambda i: (0, 0)),       # beta: VMEM-resident
        ],
        out_specs=pl.BlockSpec((bm, D_out), lambda i: (i, 0)),
        compiler_params=pltpu.CompilerParams(
            dimension_semantics=(sem,),
            vmem_limit_bytes=int(vmem_limit_bytes),
        ),
    )(x, w, b, gamma, beta)


if __name__ == "__main__":
    # Shapes consistent with the module: input_dim = nb_temp_features (pick 8),
    # output_dim = 256 (module default). batch = 32.
    B, D_IN, D_OUT = 32, 8, 256

    key = jax.random.PRNGKey(0)
    kx, kw, kb = jax.random.split(key, 3)

    x = jax.random.normal(kx, (B, D_IN), dtype=jnp.float32)

    # Deterministic parameter init (torch Linear-style uniform bound),
    # LayerNorm gamma=1, beta=0.
    bound = 1.0 / (D_IN ** 0.5)
    w = jax.random.uniform(kw, (D_IN, D_OUT), jnp.float32, -bound, bound)  # W^T layout
    b = jax.random.uniform(kb, (1, D_OUT), jnp.float32, -bound, bound)
    gamma = jnp.ones((1, D_OUT), jnp.float32)
    beta = jnp.zeros((1, D_OUT), jnp.float32)

    # Pure-JAX reference.
    h_ref = jnp.maximum(x @ w + b, 0.0)
    mu = jnp.mean(h_ref, axis=-1, keepdims=True)
    var = jnp.mean((h_ref - mu) ** 2, axis=-1, keepdims=True)
    ref = (h_ref - mu) / jnp.sqrt(var + LN_EPS) * gamma + beta

    # 1) Small tile so the grid runs 4 pipelined steps (exercises tiling path).
    out = date_mlp(x, w, b, gamma, beta, block_m=8)
    jax.block_until_ready(out)
    assert out.shape == (B, D_OUT)
    assert jnp.max(jnp.abs(out - ref)) < 1e-4

    # 2) Default tile (whole batch fits -> single step), f32 output.
    out2 = date_mlp(x, w, b, gamma, beta)
    jax.block_until_ready(out2)
    assert jnp.max(jnp.abs(out2 - ref)) < 1e-4

    # 3) bf16 output (halves HBM writeback traffic at the mem-bound roofline).
    out_bf16 = date_mlp(x, w, b, gamma, beta, out_dtype=jnp.bfloat16)
    jax.block_until_ready(out_bf16)
    assert jnp.max(jnp.abs(out_bf16.astype(jnp.float32) - ref)) < 3e-2

    print("KERNEL_OK")
</pallas_src>

<mosaic_0001>
module attributes {stable_mosaic.version = 11 : i64} {
  func.func @datemlp_kernel(%arg0: i32, %arg1: memref<8x8xf32, #tpu.memory_space<vmem>>, %arg2: memref<8x256xf32, #tpu.memory_space<vmem>>, %arg3: memref<1x256xf32, #tpu.memory_space<vmem>>, %arg4: memref<1x256xf32, #tpu.memory_space<vmem>>, %arg5: memref<1x256xf32, #tpu.memory_space<vmem>>, %arg6: memref<8x256xf32, #tpu.memory_space<vmem>>) attributes {dimension_semantics = [#tpu.dimension_semantics<parallel>], iteration_bounds = array<i64: 4>, scalar_prefetch = 0 : i64, scratch_operands = 0 : i64, tpu.core_type = #tpu.core_type<tc>, window_params = [{transform_indices = @transform_0, window_bounds = array<i64: 8, 8>}, {pipeline_mode = #tpu.pipeline_mode<synchronous>, transform_indices = @transform_1, window_bounds = array<i64: 8, 256>}, {pipeline_mode = #tpu.pipeline_mode<synchronous>, transform_indices = @transform_2, window_bounds = array<i64: 1, 256>}, {pipeline_mode = #tpu.pipeline_mode<synchronous>, transform_indices = @transform_3, window_bounds = array<i64: 1, 256>}, {pipeline_mode = #tpu.pipeline_mode<synchronous>, transform_indices = @transform_4, window_bounds = array<i64: 1, 256>}, {transform_indices = @transform_5, window_bounds = array<i64: 8, 256>}]} {
    %c0 = arith.constant 0 : index
    %c0_0 = arith.constant 0 : index
    %0 = vector.load %arg1[%c0, %c0_0] : memref<8x8xf32, #tpu.memory_space<vmem>>, vector<8x8xf32>
    %c0_1 = arith.constant 0 : index
    %c0_2 = arith.constant 0 : index
    %1 = vector.load %arg2[%c0_1, %c0_2] : memref<8x256xf32, #tpu.memory_space<vmem>>, vector<8x256xf32>
    %cst = arith.constant dense<0.000000e+00> : vector<8x256xf32>
    %2 = tpu.matmul %0, %1, %cst {dimension_numbers = #tpu.dot_dimension_numbers<[1], [0], [0], [1], [0, 0, 1, 1], [], []>} : vector<8x8xf32>, vector<8x256xf32>, vector<8x256xf32> -> vector<8x256xf32>
    %c0_3 = arith.constant 0 : index
    %c0_4 = arith.constant 0 : index
    %3 = vector.load %arg3[%c0_3, %c0_4] : memref<1x256xf32, #tpu.memory_space<vmem>>, vector<1x256xf32>
    %4 = vector.broadcast %3 : vector<1x256xf32> to vector<8x256xf32>
    %5 = arith.addf %2, %4 : vector<8x256xf32>
    %cst_5 = arith.constant 0.000000e+00 : f32
    %6 = vector.broadcast %cst_5 : f32 to vector<8x256xf32>
    %7 = arith.maximumf %5, %6 : vector<8x256xf32>
    %cst_6 = arith.constant dense<0.000000e+00> : vector<8xf32>
    %8 = vector.multi_reduction <add>, %7, %cst_6 [1] : vector<8x256xf32> to vector<8xf32>
    %9 = vector.shape_cast %8 : vector<8xf32> to vector<8x1xf32>
    %cst_7 = arith.constant 2.560000e+02 : f32
    %10 = vector.broadcast %cst_7 : f32 to vector<8x1xf32>
    %11 = arith.divf %9, %10 : vector<8x1xf32>
    %12 = arith.mulf %7, %7 : vector<8x256xf32>
    %cst_8 = arith.constant dense<0.000000e+00> : vector<8xf32>
    %13 = vector.multi_reduction <add>, %12, %cst_8 [1] : vector<8x256xf32> to vector<8xf32>
    %14 = vector.shape_cast %13 : vector<8xf32> to vector<8x1xf32>
    %cst_9 = arith.constant 2.560000e+02 : f32
    %15 = vector.broadcast %cst_9 : f32 to vector<8x1xf32>
    %16 = arith.divf %14, %15 : vector<8x1xf32>
    %17 = arith.mulf %11, %11 : vector<8x1xf32>
    %18 = arith.subf %16, %17 : vector<8x1xf32>
    %cst_10 = arith.constant 0.000000e+00 : f32
    %19 = vector.broadcast %cst_10 : f32 to vector<8x1xf32>
    %20 = arith.maximumf %18, %19 : vector<8x1xf32>
    %cst_11 = arith.constant 9.99999974E-6 : f32
    %21 = vector.broadcast %cst_11 : f32 to vector<8x1xf32>
    %22 = arith.addf %20, %21 : vector<8x1xf32>
    %23 = math.rsqrt %22 : vector<8x1xf32>
    %c0_12 = arith.constant 0 : index
    %c0_13 = arith.constant 0 : index
    %24 = vector.load %arg4[%c0_12, %c0_13] : memref<1x256xf32, #tpu.memory_space<vmem>>, vector<1x256xf32>
    %25 = vector.broadcast %23 : vector<8x1xf32> to vector<8x256xf32>
    %26 = vector.broadcast %24 : vector<1x256xf32> to vector<8x256xf32>
    %27 = arith.mulf %25, %26 : vector<8x256xf32>
    %c0_14 = arith.constant 0 : index
    %c0_15 = arith.constant 0 : index
    %28 = vector.load %arg5[%c0_14, %c0_15] : memref<1x256xf32, #tpu.memory_space<vmem>>, vector<1x256xf32>
    %29 = vector.broadcast %11 : vector<8x1xf32> to vector<8x256xf32>
    %30 = arith.mulf %29, %27 : vector<8x256xf32>
    %31 = vector.broadcast %28 : vector<1x256xf32> to vector<8x256xf32>
    %32 = arith.subf %31, %30 : vector<8x256xf32>
    %33 = arith.mulf %7, %27 : vector<8x256xf32>
    %34 = arith.addf %33, %32 : vector<8x256xf32>
    %c0_16 = arith.constant 0 : index
    %c0_17 = arith.constant 0 : index
    %35 = vector.load %arg6[%c0_16, %c0_17] : memref<8x256xf32, #tpu.memory_space<vmem>>, vector<8x256xf32>
    tpu.vector_store %arg6[%c0_16, %c0_17], %34 {strides = array<i32>} : memref<8x256xf32, #tpu.memory_space<vmem>>, vector<8x256xf32>,
    return
  }
  func.func @transform_0(%arg0: i32) -> (i32, i32) {
    %c0_i32 = arith.constant 0 : i32
    %c0_i32_0 = arith.constant 0 : i32
    return %arg0, %c0_i32 : i32, i32
  }
  func.func @transform_1(%arg0: i32) -> (i32, i32) {
    %c0_i32 = arith.constant 0 : i32
    %c0_i32_0 = arith.constant 0 : i32
    %c0_i32_1 = arith.constant 0 : i32
    return %c0_i32, %c0_i32_0 : i32, i32
  }
  func.func @transform_2(%arg0: i32) -> (i32, i32) {
    %c0_i32 = arith.constant 0 : i32
    %c0_i32_0 = arith.constant 0 : i32
    %c0_i32_1 = arith.constant 0 : i32
    return %c0_i32, %c0_i32_0 : i32, i32
  }
  func.func @transform_3(%arg0: i32) -> (i32, i32) {
    %c0_i32 = arith.constant 0 : i32
    %c0_i32_0 = arith.constant 0 : i32
    %c0_i32_1 = arith.constant 0 : i32
    return %c0_i32, %c0_i32_0 : i32, i32
  }
  func.func @transform_4(%arg0: i32) -> (i32, i32) {
    %c0_i32 = arith.constant 0 : i32
    %c0_i32_0 = arith.constant 0 : i32
    %c0_i32_1 = arith.constant 0 : i32
    return %c0_i32, %c0_i32_0 : i32, i32
  }
  func.func @transform_5(%arg0: i32) -> (i32, i32) {
    %c0_i32 = arith.constant 0 : i32
    %c0_i32_0 = arith.constant 0 : i32
    return %arg0, %c0_i32 : i32, i32
  }
}

</mosaic_0001>

<bundles_post_ra>
// kernel: tpu_custom_call.1
= control target key start
LH: loop header
LB: loop body
LE: loop exit
PB: predicated region body
PF: predicated region fallthrough
CT: control target
= control target key end

     0   :  { %10 = vsyncpa [#allocation3], 0  ;;  %s663_s0 = inlined_call_operand.vmem [shape: f32[32,8], index: 0, kind: input, shape index: {}]   ;;  %s664_s1 = inlined_call_operand.vmem [shape: f32[8,256], index: 1, kind: input, shape index: {}]   ;;  %s665_s2 = inlined_call_operand.vmem [shape: f32[1,256], index: 2, kind: input, shape index: {}]   ;;  %s666_s3 = inlined_call_operand.vmem [shape: f32[1,256], index: 3, kind: input, shape index: {}]   ;;  %s667_s4 = inlined_call_operand.vmem [shape: f32[1,256], index: 4, kind: input, shape index: {}]   ;;  %s668_s5 = inlined_call_operand.hbm [shape: f32[32,256], index: 5, kind: output, shape index: {}]  }
   0x1   :  { %12 = vsyncpa [#allocation3 + $0x1], 0  ;;  %s559_s18 = smov 0   ;;  %s561_s19 = smov 0  }
   0x2   :  { %s563_s20 = smov 0   ;;  %s565_s21 = smov 0  }
   0x3 LB: > { %s580_s22 = sadd.s32 4294967295, %s526_s21   ;;  %s406_s23 = sadd.s32 4294967294, %s526_s21   ;;  %s526_s21 = sphi %s565_s21, %s674_s21   ;;  %s522_s20 = sphi %s563_s20, %s673_s20   ;;  %s518_s19 = sphi %s561_s19, %s672_s19   ;;  %s514_s18 = sphi %s559_s18, %s671_s18  }
   0x4   : > { %s584_s24 = sadd.s32 1, %s526_s21   ;;  %s135_s25 = sadd.s32 1, %s522_s20 }
   0x5   : > { %s132_s26 = ssub.s32 %s526_s21, %s584_s24  ;;  %p145_p0 = scmp.ne.s32.totalorder %s522_s20, %s518_s19 }
   0x6   : > { %p133_p1 = scmp.eq.s32.totalorder %s132_s26, 0  ;;  %p146_p2 = scmp.eq.s32.totalorder %s580_s22, 3 }
   0x7   : > { %p151_p3 = scmp.ne.s32.totalorder %s518_s19, %s514_s18  ;;  %p152_p4 = scmp.eq.s32.totalorder %s406_s23, 3 }
   0x8   : > { %s595_s27 = scalar_select %p133_p1, %s522_s20, %s135_s25  }
   0x9   : > { %p597_p5 = por %p146_p2, %p145_p0  ;;  %p601_p6 = por %p152_p4, %p151_p3 }
   0xa   : > { %p409_p7 = scmp.ge.s32.totalorder %s526_s21, 1  ;;  %p189_p8 = scmp.lt.s32.totalorder %s526_s21, 5 }
   0xc   : > { %p190_p9 = pnand %p409_p7, %p189_p8 }
   0xd   : > { %p216_p10 = scmp.lt.s32.totalorder (!%p190_p9), %s580_s22, 3  ;;  %s213_s23 = sand.u32 (!%p190_p9), 1, %s518_s19  }
   0xe   : > { %193 = sbr.rel (%p190_p9) target bundleno = 318 (0x13e), region = 40  ;;  %s410_s30 = sshll.u32 (!%p190_p9), %s213_s23, 4 }
   0xf   : > { %s419_s6 = sshll.u32 (!%p190_p9), %s580_s22, 4  ;;  %s331_s12 = scalar_lea.sflag (!%p190_p9), [#allocation3], %s213_s23 }
  0x10   : > { %s484_s17 = scalar_lea.hbm (!%p190_p9), %s668_s5, 64 }
  0x13   : > { %v221_v0 = vld [vmem:[%s664_s1] sm:$0xff]  ;;  %v222_v1 = vld [vmem:[%s664_s1 + $0x8] sm:$0xff]  ;;  %s217_s9 = scalar_select %p216_p10, %s580_s22, 3  ;;  %vm229_vm0 = vcmask 64512   ;;  %v528_v16 = vmov 256.0  }
  0x14   : > { %248 = vmatpush.msra.mxu0 %v221_v0  ;;  %268 = vmatpush.msra.mxu1 %v222_v1  ;;  %v223_v3 = vld [vmem:[%s665_s2] sm:$0x3]  ;;  %460 = vrcp.f32 %v528_v16 }
  0x15   : > { %s411_s10 = sshll.u32 %s217_s9, 3  ;;  %v225_v4 = vperm.slane %v223_v3, 0  ;;  %v226_v5 = vperm.slane %v223_v3, 1  ;;  %v306_v35 = vld [vmem:[%s666_s3] sm:$0x3]  ;;  %s342_s9 = scalar_lea.hbm %s668_s5, %s419_s6 }
  0x16   : > { %s219_s13 = scalar_lea.vmem %s663_s0, %s411_s10  ;;  %v308_v37 = vperm.slane %v306_v35, 0  ;;  %v309_v38 = vperm.slane %v306_v35, 1  ;;  %v314_v40 = vld [vmem:[%s667_s4] sm:$0x3]  ;;  %s215_s10 = scalar_lea.vmem [#allocation2], %s410_s30 }
  0x17   : > { %v220_v2 = vld [vmem:[%s219_s13] sm:$0xff]  ;;  %v318_v44 = vperm.slane %v314_v40, 0  ;;  %v319_v45 = vperm.slane %v314_v40, 1  ;;  %s344_s11 = sshll.u32 %s215_s10, 4  ;;  %s346_s22 = sshll.u32 %s342_s9, 4  ;;  %s345_s11 = int_to_ptr.vmem [resolvable:$true] %s344_s11  ;;  %s347_s22 = int_to_ptr.hbm [resolvable:$true] %s346_s22 }
  0x18   : > { %412 = vmatmul.msk.f32.vlgmr.msra.gmra.mxu0 %vm229_vm0, %v220_v2  ;;  %413 = vmatmul.msk.f32.vlgmr.msra.gmra.mxu1 %vm229_vm0, %v220_v2  ;;  %s478_s13 = sshra.s32 %s347_s22, 4  ;;  %s479_s13 = int_to_ptr.hbm [resolvable:$true] %s478_s13 }
  0x19   : > { %s480_s14 = scalar_lea.hbm %s479_s13, 16  ;;  %p485_p0 = scmp.lt.s32.totalorder %s479_s13, %s668_s5 }
  0x1a   : > { %v461_v17 = vpop.eup %460  ;;  %p481_p11 = scmp.ne.s32.totalorder %s479_s13, %s480_s14  ;;  %p486_p1 = scmp.lt.s32.totalorder %s484_s17, %s480_s14 }
  0x1b   : > { %v279_v18 = vmul.f32 256.0, %v461_v17  ;;  %vm283_vm1 = vweird.f32 %v461_v17 }
  0x1c   : > { %p482_p12 = pnand %p481_p11, %p597_p5  ;;  %p487_p2 = por %p486_p1, %p485_p0 }
  0x1d   : > { %v280_v19 = vsub.f32 1.0, %v279_v18 }
  0x1e   : > { %p483_p13 = pneg %p482_p12 }
  0x1f   : > { %v281_v20 = vmul.f32 %v461_v17, %v280_v19 }
  0x20   : > { %p488_p3 = pnand %p487_p2, %p483_p13 }
  0x21   : > { %v282_v21 = vadd.f32 %v461_v17, %v281_v20 }
  0x23   : > { %v284_v23 = vsel %vm283_vm1, %v461_v17, %v282_v21 }
  0x95   : > { %v250_v6 = vpop.f32.mrf.mxu0  ;;  %v270_v7 = vpop.f32.mrf.mxu1 }
  0x96   : > { %v251_v8 = vadd.f32 %v250_v6, %v225_v4  ;;  %v271_v9 = vadd.f32 %v270_v7, %v226_v5 }
  0x98   : > { %v273_v10 = vmax.f32 %v251_v8, 0.0  ;;  %v274_v11 = vmax.f32 %v271_v9, 0.0 }
  0x9a   : > { %v275_v12 = vadd.f32 %v274_v11, %v273_v10  ;;  %v286_v13 = vmul.f32 %v273_v10, %v273_v10  ;;  %v287_v14 = vmul.f32 %v274_v11, %v274_v11 }
  0x9c   : > { %276 = vadd.xlane.f32.xlu0 %v275_v12  ;;  %v288_v15 = vadd.f32 %v287_v14, %v286_v13 }
  0xa4   : > { %289 = vadd.xlane.f32.xlu0 %v288_v15 }
 0x10f   : > { %v277_v22 = vpop.xlane.xlu0 %276 }
 0x110   : > { %v285_v24 = vmul.f32 %v284_v23, %v277_v22 }
 0x112   : > { %v292_v26 = vmul.f32 %v285_v24, %v285_v24 }
 0x117   : > { %v290_v25 = vpop.xlane.xlu0 %289 }
 0x118   : > { %v291_v27 = vmul.f32 %v290_v25, %v284_v23 }
 0x11a   : > { %v293_v28 = vsub.f32 %v291_v27, %v292_v26 }
 0x11c   : > { %v294_v29 = vmax.f32 %v293_v28, 0.0 }
 0x11e   : > { %v295_v30 = vadd.f32 1e-05, %v294_v29 }
 0x120   : > { %462 = vrsqrt.f32 %v295_v30  ;;  %vm302_vm3 = vweird.f32 %v295_v30 }
 0x126   : > { %v463_v31 = vpop.eup %462 }
 0x127   : > { %v297_v32 = vmul.f32 %v463_v31, %v295_v30  ;;  %vm303_vm2 = vweird.f32 %v463_v31 }
 0x128   : > { %vm304_vm4 = vmor %vm302_vm3, %vm303_vm2 }
 0x129   : > { %v298_v33 = vmul.f32 %v463_v31, %v297_v32 }
 0x12b   : > { %v299_v34 = vmul.f32 0.5, %v298_v33 }
 0x12d   : > { %v300_v36 = vsub.f32 1.5, %v299_v34 }
 0x12f   : > { %v301_v39 = vmul.f32 %v463_v31, %v300_v36 }
 0x131   : > { %v305_v41 = vsel %vm304_vm4, %v463_v31, %v301_v39 }
 0x132   : > { %v312_v42 = vmul.f32 %v308_v37, %v305_v41  ;;  %v313_v43 = vmul.f32 %v309_v38, %v305_v41 }
 0x134   : > { %v315_v46 = vmul.f32 %v312_v42, %v285_v24  ;;  %v316_v47 = vmul.f32 %v313_v43, %v285_v24  ;;  %v324_v50 = vmul.f32 %v312_v42, %v273_v10  ;;  %v325_v51 = vmul.f32 %v313_v43, %v274_v11 }
 0x136   : > { %v322_v48 = vsub.f32 %v318_v44, %v315_v46  ;;  %v323_v49 = vsub.f32 %v319_v45, %v316_v47 }
 0x138   : > { %v326_v52 = vadd.f32 %v324_v50, %v322_v48  ;;  %v327_v53 = vadd.f32 %v325_v51, %v323_v49 }
 0x13a   : > { %328 = vst [vmem:[%s215_s10] sm:$0xff] %v326_v52 }
 0x13b   : > { %329 = vst [vmem:[%s215_s10 + $0x8] sm:$0xff] %v327_v53 }
 0x13c   : > { %491 = shalt.err (!%p488_p3)
}
 0x13d   : > { %420 = dma.vmem_to_hbm [thread:$0]  (%p597_p5), %s345_s11, 256, %s347_s22, %s331_s12  }
 0x13e PF: > { %p426_p4 = scmp.ge.s32.totalorder %s526_s21, 2  ;;  %s358_s23 = sand.u32 1, %s514_s18  }
 0x13f   : > { %s359_s30 = scalar_lea.sflag [#allocation3], %s358_s23 }
 0x140   : > { %p423_p7 = pnand %p426_p4, %p601_p6 }
 0x142   : > { %p424_p8 = pneg %p423_p7 }
 0x144   : > { %509 = dma.done.wait (%p424_p8), %s359_s30, 256  }
 0x145   : > { %511 = vsyncadd (%p424_p8), %s359_s30, 4294967040  ;;  %p15_p9 = scmp.ge.s32.totalorder %s584_s24, 6   ;;  %s671_s18 = smov %s518_s19 }
 0x146   : > { %s672_s19 = smov %s522_s20  ;;  %s673_s20 = smov %s595_s27 }
 0x147   : > { %s674_s21 = smov %s584_s24  ;;  %17 = sbr.rel (!%p15_p9) target bundleno = 3 (0x3), region = 75 }
 0x14c   :  { %365 = vsyncpa [#allocation3], 1 }
 0x14d   :  { %367 = vsyncpa [#allocation3 + $0x1], 1 }

</bundles_post_ra>
